<compile_context>
chip_gen: v7x
topology: tpu7x:2x2x1
jax: 0.10.0
libtpu: 0.0.40
codegen_flags: <defaults>
</compile_context>

<pallas_src>
import functools

import jax
import jax.numpy as jnp
from jax import lax
from jax.experimental import pallas as pl
from jax.experimental.pallas import tpu as pltpu


def _make_kernel(k: int, s: int, h: int, w: int, h_out: int, w_out: int):
    """Max pool with window k, stride s = k-1, replicate pad on the right/bottom.

    Block layout is (H, W, NC_TILE): H = untiled leading dim, W = sublane, NC = lane.
    """

    def kernel(x_ref, o_ref):
        x = x_ref[...]                       # (h, w, nc_t)
        nc = x.shape[-1]

        # ---- reduce along W (sublane axis), replicate the right edge in VMEM ----
        wp = s * (w_out + 1)                 # padded width; wp >= w + 1 always
        xw = jnp.concatenate([x] + [x[:, w - 1:w, :]] * (wp - w), axis=1)   # (h, wp, nc)
        if s == 1:
            # k == 2 fast path: out col j = max(x[:, j], x[:, min(j+1, w-1)])
            tmp = jnp.maximum(xw[:, :w_out, :], xw[:, 1:w_out + 1, :])
        else:
            # Window offsets are {0..s-1} U {s} (k = s + 1): group the padded width
            # into (w_out+1, s) chunks -> "head" covers offsets 0..s-1, "tail" (first
            # element of the next chunk) covers offset s.  No strided slices needed.
            xr = xw.reshape(h, w_out + 1, s, nc)
            head = jnp.max(xr[:, :w_out], axis=2)
            tail = xr[:, 1:, 0, :]
            tmp = jnp.maximum(head, tail)                                   # (h, w_out, nc)

        # ---- reduce along H (leading axis), replicate the bottom edge in VMEM ----
        hp = s * (h_out + 1)
        th = jnp.concatenate([tmp] + [tmp[h - 1:h, :, :]] * (hp - h), axis=0)  # (hp, w_out, nc)
        if s == 1:
            out = jnp.maximum(th[:h_out], th[1:h_out + 1])
        else:
            tr = th.reshape(h_out + 1, s, w_out, nc)
            head = jnp.max(tr[:h_out], axis=1)
            tail = tr[1:, 0, :, :]
            out = jnp.maximum(head, tail)                                   # (h_out, w_out, nc)

        o_ref[...] = out

    return kernel


def _pick_nc_tile(nc: int, h: int, w: int, h_out: int, w_out: int, itemsize: int) -> int:
    """Largest lane-aligned channel tile whose double-buffered blocks + in-kernel
    temporaries fit comfortably under the scoped-VMEM limit (sized for v7x's 64 MiB)."""
    per_ch = (5 * h * w + 2 * h_out * w_out) * itemsize   # blocks (x2 buffered) + temps
    budget = 20 * 1024 * 1024
    max_tile = max(1, budget // per_ch)
    if nc <= max_tile:
        return nc                                          # whole channel axis in one block
    tile = (max_tile // 128) * 128
    return min(nc, max(tile, 128))                         # partial tiles must be lane-aligned


@functools.partial(jax.jit, static_argnames=("kernel_size",))
def maxpool_stride1(x: jax.Array, kernel_size: int) -> jax.Array:
    """Pallas implementation of MaxPoolStride1.forward. x is NCHW."""
    assert kernel_size >= 2, "kernel_size must be >= 2 (stride = kernel_size - 1)"
    k = kernel_size
    s = k - 1                                  # PyTorch module: stride = pad = k - 1
    n, c, h, w = x.shape
    h_out = (h - 1) // s + 1
    w_out = (w - 1) // s + 1
    nc = n * c

    # Layout plumbing: channels-last so N*C sits on the TPU lane axis (lane-dense I/O).
    xt = jnp.transpose(x.reshape(nc, h, w), (1, 2, 0))     # (H, W, N*C)

    nc_tile = _pick_nc_tile(nc, h, w, h_out, w_out, x.dtype.itemsize)
    grid = (pl.cdiv(nc, nc_tile),)

    out_t = pl.pallas_call(
        _make_kernel(k, s, h, w, h_out, w_out),
        out_shape=jax.ShapeDtypeStruct((h_out, w_out, nc), x.dtype),
        grid=grid,
        in_specs=[pl.BlockSpec((h, w, nc_tile), lambda i: (0, 0, i))],
        out_specs=pl.BlockSpec((h_out, w_out, nc_tile), lambda i: (0, 0, i)),
        compiler_params=pltpu.CompilerParams(
            dimension_semantics=("parallel",),             # lets v7x's 2 TCs split the NC axis
            vmem_limit_bytes=32 * 1024 * 1024,
        ),
    )(xt)

    return jnp.transpose(out_t, (2, 0, 1)).reshape(n, c, h_out, w_out)


def _reference(x: jax.Array, kernel_size: int) -> jax.Array:
    """Pure-JAX reference matching the PyTorch module."""
    pad = kernel_size - 1
    xp = jnp.pad(x, ((0, 0), (0, 0), (0, pad), (0, pad)), mode="edge")
    return lax.reduce_window(
        xp,
        -jnp.inf,
        lax.max,
        window_dimensions=(1, 1, kernel_size, kernel_size),
        window_strides=(1, 1, pad, pad),
        padding="VALID",
    )


if __name__ == "__main__":
    key = jax.random.PRNGKey(0)
    # Small NCHW input consistent with a yolov3 feature map; kernel_size=2 is the
    # configuration MaxPoolStride1 is used with in yolov3-tiny (stride-1 maxpool).
    x = jax.random.normal(key, (2, 4, 16, 16), dtype=jnp.float32)
    kernel_size = 2

    out = jax.block_until_ready(maxpool_stride1(x, kernel_size))

    ref = _reference(x, kernel_size)
    assert out.shape == ref.shape, (out.shape, ref.shape)
    assert jnp.allclose(out, ref), "Pallas output mismatch vs reference"

    print("KERNEL_OK")
</pallas_src>

<mosaic_0001>
module attributes {stable_mosaic.version = 11 : i64} {
  func.func @kernel(%arg0: i32, %arg1: memref<16x16x8xf32, #tpu.memory_space<vmem>>, %arg2: memref<16x16x8xf32, #tpu.memory_space<vmem>>) attributes {dimension_semantics = [#tpu.dimension_semantics<parallel>], iteration_bounds = array<i64: 1>, scalar_prefetch = 0 : i64, scratch_operands = 0 : i64, tpu.core_type = #tpu.core_type<tc>, window_params = [{transform_indices = @transform_0, window_bounds = array<i64: 16, 16, 8>}, {transform_indices = @transform_1, window_bounds = array<i64: 16, 16, 8>}]} {
    %c0 = arith.constant 0 : index
    %c0_0 = arith.constant 0 : index
    %c0_1 = arith.constant 0 : index
    %0 = vector.load %arg1[%c0, %c0_0, %c0_1] : memref<16x16x8xf32, #tpu.memory_space<vmem>>, vector<16x16x8xf32>
    %1 = vector.extract_strided_slice %0 {offsets = [0, 15, 0], sizes = [16, 1, 8], strides = [1, 1, 1]} : vector<16x16x8xf32> to vector<16x1x8xf32>
    %2 = tpu.concatenate %0, %1 in 1 : vector<16x16x8xf32>, vector<16x1x8xf32> -> vector<16x17x8xf32>
    %3 = vector.extract_strided_slice %2 {offsets = [0, 0, 0], sizes = [16, 16, 8], strides = [1, 1, 1]} : vector<16x17x8xf32> to vector<16x16x8xf32>
    %4 = vector.extract_strided_slice %2 {offsets = [0, 1, 0], sizes = [16, 16, 8], strides = [1, 1, 1]} : vector<16x17x8xf32> to vector<16x16x8xf32>
    %5 = arith.maximumf %3, %4 : vector<16x16x8xf32>
    %6 = vector.extract_strided_slice %5 {offsets = [15, 0, 0], sizes = [1, 16, 8], strides = [1, 1, 1]} : vector<16x16x8xf32> to vector<1x16x8xf32>
    %7 = tpu.concatenate %5, %6 in 0 : vector<16x16x8xf32>, vector<1x16x8xf32> -> vector<17x16x8xf32>
    %8 = vector.extract_strided_slice %7 {offsets = [0, 0, 0], sizes = [16, 16, 8], strides = [1, 1, 1]} : vector<17x16x8xf32> to vector<16x16x8xf32>
    %9 = vector.extract_strided_slice %7 {offsets = [1, 0, 0], sizes = [16, 16, 8], strides = [1, 1, 1]} : vector<17x16x8xf32> to vector<16x16x8xf32>
    %10 = arith.maximumf %8, %9 : vector<16x16x8xf32>
    %c0_2 = arith.constant 0 : index
    %c0_3 = arith.constant 0 : index
    %c0_4 = arith.constant 0 : index
    %11 = vector.load %arg2[%c0_2, %c0_3, %c0_4] : memref<16x16x8xf32, #tpu.memory_space<vmem>>, vector<16x16x8xf32>
    tpu.vector_store %arg2[%c0_2, %c0_3, %c0_4], %10 {strides = array<i32>} : memref<16x16x8xf32, #tpu.memory_space<vmem>>, vector<16x16x8xf32>,
    return
  }
  func.func @transform_0(%arg0: i32) -> (i32, i32, i32) {
    %c0_i32 = arith.constant 0 : i32
    %c0_i32_0 = arith.constant 0 : i32
    %c0_i32_1 = arith.constant 0 : i32
    return %c0_i32, %c0_i32_0, %arg0 : i32, i32, i32
  }
  func.func @transform_1(%arg0: i32) -> (i32, i32, i32) {
    %c0_i32 = arith.constant 0 : i32
    %c0_i32_0 = arith.constant 0 : i32
    %c0_i32_1 = arith.constant 0 : i32
    return %c0_i32, %c0_i32_0, %arg0 : i32, i32, i32
  }
}

</mosaic_0001>

<bundles_post_ra>
// kernel: maxpool_stride1.1
= control target key start
LH: loop header
LB: loop body
LE: loop exit
PB: predicated region body
PF: predicated region fallthrough
CT: control target
= control target key end

     0   :  { %vm88_vm0 = vcmask 1046528   ;;  %vm263_vm1 = vcmask 64512   ;;  %s582_s0 = inlined_call_operand.vmem [shape: f32[16,16,8], index: 0, kind: input, shape index: {}]   ;;  %s583_s1 = inlined_call_operand.vmem [shape: f32[16,16,8], index: 1, kind: output, shape index: {}]  }
   0x1   :  { %v8_v0 = vld [vmem:[%s582_s0] sm:$0xff]  ;;  %v9_v1 = vld [vmem:[%s582_s0 + $0x8] sm:$0xff]  ;;  %v10_v2 = vld [vmem:[%s582_s0 + $0x10] sm:$0xff] }
   0x2   :  { %v11_v3 = vld [vmem:[%s582_s0 + $0x18] sm:$0xff]  ;;  %v89_v4 = vrot.slane %v8_v0, 1  ;;  %v90_v5 = vrot.slane %v9_v1, 1  ;;  %v94_v6 = vrot.slane %v10_v2, 1  ;;  %v12_v7 = vld [vmem:[%s582_s0 + $0x20] sm:$0xff]  ;;  %v13_v8 = vld [vmem:[%s582_s0 + $0x28] sm:$0xff] }
   0x3   :  { %v95_v9 = vrot.slane %v11_v3, 1  ;;  %v99_v10 = vrot.slane %v12_v7, 1  ;;  %v100_v11 = vrot.slane %v13_v8, 1  ;;  %v14_v12 = vld [vmem:[%s582_s0 + $0x30] sm:$0xff]  ;;  %v15_v13 = vld [vmem:[%s582_s0 + $0x38] sm:$0xff]  ;;  %v16_v26 = vld [vmem:[%s582_s0 + $0x40] sm:$0xff] }
   0x4   :  { %v91_v14 = vsel %vm88_vm0, %v89_v4, %v90_v5  ;;  %v93_v15 = vsel %vm88_vm0, %v90_v5, %v9_v1  ;;  %v104_v16 = vrot.slane %v14_v12, 1  ;;  %v105_v17 = vrot.slane %v15_v13, 1  ;;  %v17_v27 = vld [vmem:[%s582_s0 + $0x48] sm:$0xff]  ;;  %v18_v32 = vld [vmem:[%s582_s0 + $0x50] sm:$0xff]  ;;  %v19_v33 = vld [vmem:[%s582_s0 + $0x58] sm:$0xff] }
   0x5   :  { %v96_v18 = vsel %vm88_vm0, %v94_v6, %v95_v9  ;;  %v201_v19 = vmax.f32 %v8_v0, %v91_v14  ;;  %v98_v20 = vsel %vm88_vm0, %v95_v9, %v11_v3  ;;  %v202_v21 = vmax.f32 %v9_v1, %v93_v15  ;;  %v20_v38 = vld [vmem:[%s582_s0 + $0x60] sm:$0xff]  ;;  %v21_v39 = vld [vmem:[%s582_s0 + $0x68] sm:$0xff]  ;;  %v22_v56 = vld [vmem:[%s582_s0 + $0x70] sm:$0xff] }
   0x6   :  { %v203_v22 = vmax.f32 %v10_v2, %v96_v18  ;;  %v204_v23 = vmax.f32 %v11_v3, %v98_v20  ;;  %v101_v24 = vsel %vm88_vm0, %v99_v10, %v100_v11  ;;  %v103_v25 = vsel %vm88_vm0, %v100_v11, %v13_v8  ;;  %v23_v57 = vld [vmem:[%s582_s0 + $0x78] sm:$0xff]  ;;  %v24_v62 = vld [vmem:[%s582_s0 + $0x80] sm:$0xff]  ;;  %v25_v63 = vld [vmem:[%s582_s0 + $0x88] sm:$0xff] }
   0x7   :  { %v205_v28 = vmax.f32 %v12_v7, %v101_v24  ;;  %v206_v29 = vmax.f32 %v13_v8, %v103_v25  ;;  %v106_v30 = vsel %vm88_vm0, %v104_v16, %v105_v17  ;;  %v108_v31 = vsel %vm88_vm0, %v105_v17, %v15_v13  ;;  %v26_v4 = vld [vmem:[%s582_s0 + $0x90] sm:$0xff]  ;;  %v27_v5 = vld [vmem:[%s582_s0 + $0x98] sm:$0xff] }
   0x8   :  { %v233_v34 = vmax.f32 %v201_v19, %v203_v22  ;;  %v234_v35 = vmax.f32 %v202_v21, %v204_v23  ;;  %v207_v36 = vmax.f32 %v14_v12, %v106_v30  ;;  %v208_v37 = vmax.f32 %v15_v13, %v108_v31 }
   0x9   :  { %v235_v40 = vmax.f32 %v203_v22, %v205_v28  ;;  %v236_v41 = vmax.f32 %v204_v23, %v206_v29  ;;  %v109_v42 = vrot.slane %v16_v26, 1  ;;  %v110_v43 = vrot.slane %v17_v27, 1  ;;  %v28_v22 = vld [vmem:[%s582_s0 + $0xa0] sm:$0xff]  ;;  %v29_v23 = vld [vmem:[%s582_s0 + $0xa8] sm:$0xff] }
   0xa   :  { %264 = vst.msk [vmem:[%s583_s1] sm:$0xff] %vm263_vm1, %v233_v34  ;;  %265 = vst.msk [vmem:[%s583_s1 + $0x8] sm:$0xff] %vm263_vm1, %v234_v35  ;;  %v237_v44 = vmax.f32 %v205_v28, %v207_v36  ;;  %v238_v45 = vmax.f32 %v206_v29, %v208_v37  ;;  %v114_v46 = vrot.slane %v18_v32, 1  ;;  %v115_v47 = vrot.slane %v19_v33, 1  ;;  %v30_v28 = vld [vmem:[%s582_s0 + $0xb0] sm:$0xff]  ;;  %v31_v29 = vld [vmem:[%s582_s0 + $0xb8] sm:$0xff] }
   0xb   :  { %266 = vst.msk [vmem:[%s583_s1 + $0x10] sm:$0xff] %vm263_vm1, %v235_v40  ;;  %267 = vst.msk [vmem:[%s583_s1 + $0x18] sm:$0xff] %vm263_vm1, %v236_v41  ;;  %v111_v48 = vsel %vm88_vm0, %v109_v42, %v110_v43  ;;  %v113_v49 = vsel %vm88_vm0, %v110_v43, %v17_v27  ;;  %v119_v50 = vrot.slane %v20_v38, 1  ;;  %v120_v51 = vrot.slane %v21_v39, 1  ;;  %v32_v34 = vld [vmem:[%s582_s0 + $0xc0] sm:$0xff]  ;;  %v33_v35 = vld [vmem:[%s582_s0 + $0xc8] sm:$0xff] }
   0xc   :  { %268 = vst.msk [vmem:[%s583_s1 + $0x20] sm:$0xff] %vm263_vm1, %v237_v44  ;;  %269 = vst.msk [vmem:[%s583_s1 + $0x28] sm:$0xff] %vm263_vm1, %v238_v45  ;;  %v209_v52 = vmax.f32 %v16_v26, %v111_v48  ;;  %v210_v53 = vmax.f32 %v17_v27, %v113_v49  ;;  %v116_v54 = vsel %vm88_vm0, %v114_v46, %v115_v47  ;;  %v124_v8 = vrot.slane %v22_v56, 1 }
   0xd   :  { %v118_v55 = vsel %vm88_vm0, %v115_v47, %v19_v33  ;;  %v211_v58 = vmax.f32 %v18_v32, %v116_v54  ;;  %v121_v60 = vsel %vm88_vm0, %v119_v50, %v120_v51  ;;  %v123_v61 = vsel %vm88_vm0, %v120_v51, %v21_v39 }
   0xe   :  { %v212_v59 = vmax.f32 %v19_v33, %v118_v55  ;;  %v239_v0 = vmax.f32 %v207_v36, %v209_v52  ;;  %v240_v1 = vmax.f32 %v208_v37, %v210_v53  ;;  %v213_v2 = vmax.f32 %v20_v38, %v121_v60 }
   0xf   :  { %v214_v3 = vmax.f32 %v21_v39, %v123_v61  ;;  %v241_v6 = vmax.f32 %v209_v52, %v211_v58  ;;  %v125_v9 = vrot.slane %v23_v57, 1  ;;  %v129_v12 = vrot.slane %v24_v62, 1  ;;  %v34_v52 = vld [vmem:[%s582_s0 + $0xd0] sm:$0xff] }
  0x10   :  { %v242_v7 = vmax.f32 %v210_v53, %v212_v59  ;;  %270 = vst.msk [vmem:[%s583_s1 + $0x30] sm:$0xff] %vm263_vm1, %v239_v0  ;;  %271 = vst.msk [vmem:[%s583_s1 + $0x38] sm:$0xff] %vm263_vm1, %v240_v1  ;;  %v243_v10 = vmax.f32 %v211_v58, %v213_v2  ;;  %v130_v13 = vrot.slane %v25_v63, 1  ;;  %v134_v16 = vrot.slane %v26_v4, 1  ;;  %v35_v53 = vld [vmem:[%s582_s0 + $0xd8] sm:$0xff]  ;;  %v36_v58 = vld [vmem:[%s582_s0 + $0xe0] sm:$0xff] }
  0x11   :  { %v244_v11 = vmax.f32 %v212_v59, %v214_v3  ;;  %272 = vst.msk [vmem:[%s583_s1 + $0x40] sm:$0xff] %vm263_vm1, %v241_v6  ;;  %v126_v14 = vsel %vm88_vm0, %v124_v8, %v125_v9  ;;  %v128_v15 = vsel %vm88_vm0, %v125_v9, %v23_v57  ;;  %v135_v17 = vrot.slane %v27_v5, 1  ;;  %v37_v59 = vld [vmem:[%s582_s0 + $0xe8] sm:$0xff]  ;;  %v38_v0 = vld [vmem:[%s582_s0 + $0xf0] sm:$0xff]  ;;  %v39_v1 = vld [vmem:[%s582_s0 + $0xf8] sm:$0xff] }
  0x12   :  { %273 = vst.msk [vmem:[%s583_s1 + $0x48] sm:$0xff] %vm263_vm1, %v242_v7  ;;  %274 = vst.msk [vmem:[%s583_s1 + $0x50] sm:$0xff] %vm263_vm1, %v243_v10  ;;  %v215_v18 = vmax.f32 %v22_v56, %v126_v14  ;;  %v216_v19 = vmax.f32 %v23_v57, %v128_v15  ;;  %v131_v20 = vsel %vm88_vm0, %v129_v12, %v130_v13  ;;  %v139_v38 = vrot.slane %v28_v22, 1 }
  0x13   :  { %275 = vst.msk [vmem:[%s583_s1 + $0x58] sm:$0xff] %vm263_vm1, %v244_v11  ;;  %v133_v21 = vsel %vm88_vm0, %v130_v13, %v25_v63  ;;  %v217_v24 = vmax.f32 %v24_v62, %v131_v20  ;;  %v136_v26 = vsel %vm88_vm0, %v134_v16, %v135_v17  ;;  %v138_v27 = vsel %vm88_vm0, %v135_v17, %v27_v5 }
  0x14   :  { %v218_v25 = vmax.f32 %v25_v63, %v133_v21  ;;  %v245_v30 = vmax.f32 %v213_v2, %v215_v18  ;;  %v246_v31 = vmax.f32 %v214_v3, %v216_v19  ;;  %v219_v32 = vmax.f32 %v26_v4, %v136_v26 }
  0x15   :  { %v220_v33 = vmax.f32 %v27_v5, %v138_v27  ;;  %v247_v36 = vmax.f32 %v215_v18, %v217_v24  ;;  %v140_v39 = vrot.slane %v29_v23, 1  ;;  %v144_v42 = vrot.slane %v30_v28, 1 }
  0x16   :  { %v248_v37 = vmax.f32 %v216_v19, %v218_v25  ;;  %276 = vst.msk [vmem:[%s583_s1 + $0x60] sm:$0xff] %vm263_vm1, %v245_v30  ;;  %277 = vst.msk [vmem:[%s583_s1 + $0x68] sm:$0xff] %vm263_vm1, %v246_v31  ;;  %v249_v40 = vmax.f32 %v217_v24, %v219_v32  ;;  %v145_v43 = vrot.slane %v31_v29, 1  ;;  %v149_v46 = vrot.slane %v32_v34, 1 }
  0x17   :  { %v250_v41 = vmax.f32 %v218_v25, %v220_v33  ;;  %278 = vst.msk [vmem:[%s583_s1 + $0x70] sm:$0xff] %vm263_vm1, %v247_v36  ;;  %v141_v44 = vsel %vm88_vm0, %v139_v38, %v140_v39  ;;  %v143_v45 = vsel %vm88_vm0, %v140_v39, %v29_v23  ;;  %v150_v47 = vrot.slane %v33_v35, 1 }
  0x18   :  { %279 = vst.msk [vmem:[%s583_s1 + $0x78] sm:$0xff] %vm263_vm1, %v248_v37  ;;  %280 = vst.msk [vmem:[%s583_s1 + $0x80] sm:$0xff] %vm263_vm1, %v249_v40  ;;  %v221_v48 = vmax.f32 %v28_v22, %v141_v44  ;;  %v222_v49 = vmax.f32 %v29_v23, %v143_v45  ;;  %v146_v50 = vsel %vm88_vm0, %v144_v42, %v145_v43  ;;  %v154_v4 = vrot.slane %v34_v52, 1 }
  0x19   :  { %281 = vst.msk [vmem:[%s583_s1 + $0x88] sm:$0xff] %vm263_vm1, %v250_v41  ;;  %v148_v51 = vsel %vm88_vm0, %v145_v43, %v31_v29  ;;  %v223_v54 = vmax.f32 %v30_v28, %v146_v50  ;;  %v151_v56 = vsel %vm88_vm0, %v149_v46, %v150_v47  ;;  %v153_v57 = vsel %vm88_vm0, %v150_v47, %v33_v35 }
  0x1a   :  { %v224_v55 = vmax.f32 %v31_v29, %v148_v51  ;;  %v251_v60 = vmax.f32 %v219_v32, %v221_v48  ;;  %v252_v61 = vmax.f32 %v220_v33, %v222_v49  ;;  %v225_v62 = vmax.f32 %v32_v34, %v151_v56 }
  0x1b   :  { %v226_v63 = vmax.f32 %v33_v35, %v153_v57  ;;  %v253_v2 = vmax.f32 %v221_v48, %v223_v54  ;;  %v155_v5 = vrot.slane %v35_v53, 1  ;;  %v159_v8 = vrot.slane %v36_v58, 1 }
  0x1c   :  { %v254_v3 = vmax.f32 %v222_v49, %v224_v55  ;;  %282 = vst.msk [vmem:[%s583_s1 + $0x90] sm:$0xff] %vm263_vm1, %v251_v60  ;;  %283 = vst.msk [vmem:[%s583_s1 + $0x98] sm:$0xff] %vm263_vm1, %v252_v61  ;;  %v255_v6 = vmax.f32 %v223_v54, %v225_v62  ;;  %v160_v9 = vrot.slane %v37_v59, 1  ;;  %v164_v12 = vrot.slane %v38_v0, 1 }
  0x1d   :  { %v256_v7 = vmax.f32 %v224_v55, %v226_v63  ;;  %284 = vst.msk [vmem:[%s583_s1 + $0xa0] sm:$0xff] %vm263_vm1, %v253_v2  ;;  %v156_v10 = vsel %vm88_vm0, %v154_v4, %v155_v5  ;;  %v158_v11 = vsel %vm88_vm0, %v155_v5, %v35_v53  ;;  %v165_v13 = vrot.slane %v39_v1, 1 }
  0x1e   :  { %285 = vst.msk [vmem:[%s583_s1 + $0xa8] sm:$0xff] %vm263_vm1, %v254_v3  ;;  %286 = vst.msk [vmem:[%s583_s1 + $0xb0] sm:$0xff] %vm263_vm1, %v255_v6  ;;  %v227_v14 = vmax.f32 %v34_v52, %v156_v10  ;;  %v228_v15 = vmax.f32 %v35_v53, %v158_v11  ;;  %v161_v16 = vsel %vm88_vm0, %v159_v8, %v160_v9 }
  0x1f   :  { %287 = vst.msk [vmem:[%s583_s1 + $0xb8] sm:$0xff] %vm263_vm1, %v256_v7  ;;  %v163_v17 = vsel %vm88_vm0, %v160_v9, %v37_v59  ;;  %v229_v18 = vmax.f32 %v36_v58, %v161_v16  ;;  %v166_v20 = vsel %vm88_vm0, %v164_v12, %v165_v13  ;;  %v168_v21 = vsel %vm88_vm0, %v165_v13, %v39_v1 }
  0x20   :  { %v230_v19 = vmax.f32 %v37_v59, %v163_v17  ;;  %v257_v22 = vmax.f32 %v225_v62, %v227_v14  ;;  %v258_v23 = vmax.f32 %v226_v63, %v228_v15  ;;  %v231_v24 = vmax.f32 %v38_v0, %v166_v20 }
  0x21   :  { %v232_v25 = vmax.f32 %v39_v1, %v168_v21  ;;  %v259_v26 = vmax.f32 %v227_v14, %v229_v18 }
  0x22   :  { %v260_v27 = vmax.f32 %v228_v15, %v230_v19  ;;  %288 = vst.msk [vmem:[%s583_s1 + $0xc0] sm:$0xff] %vm263_vm1, %v257_v22  ;;  %289 = vst.msk [vmem:[%s583_s1 + $0xc8] sm:$0xff] %vm263_vm1, %v258_v23  ;;  %v261_v28 = vmax.f32 %v229_v18, %v231_v24 }
  0x23   :  { %294 = vst.msk [vmem:[%s583_s1 + $0xf0] sm:$0xff] %vm263_vm1, %v231_v24  ;;  %v262_v29 = vmax.f32 %v230_v19, %v232_v25  ;;  %295 = vst.msk [vmem:[%s583_s1 + $0xf8] sm:$0xff] %vm263_vm1, %v232_v25 }
  0x24   :  { %290 = vst.msk [vmem:[%s583_s1 + $0xd0] sm:$0xff] %vm263_vm1, %v259_v26  ;;  %291 = vst.msk [vmem:[%s583_s1 + $0xd8] sm:$0xff] %vm263_vm1, %v260_v27 }
  0x25   :  { %292 = vst.msk [vmem:[%s583_s1 + $0xe0] sm:$0xff] %vm263_vm1, %v261_v28  ;;  %293 = vst.msk [vmem:[%s583_s1 + $0xe8] sm:$0xff] %vm263_vm1, %v262_v29 }

</bundles_post_ra>
